<compile_context>
chip_gen: v7x
topology: tpu7x:2x2x1
jax: 0.10.0
libtpu: 0.0.40
codegen_flags: <defaults>
</compile_context>

<pallas_src>
import functools
import math

import jax
import jax.numpy as jnp
from jax.experimental import pallas as pl
from jax.experimental.pallas import tpu as pltpu

# OSI MLP widths (PyTorch: in -> 256 -> 128 -> 64 -> out).
H1 = 256          # already lane-aligned (2 x 128)
H2 = 128
H3 = 64
H3_PAD = 128      # pad 64 -> 128 (zero columns are inert through tanh and the next matmul)
OUT_PAD = 128     # lane-dense output block; real out_dim columns are sliced off in the wrapper


def _osi_kernel(x_ref, w1_ref, b1_ref, w2_ref, b2_ref, w3_ref, b3_ref,
                w4_ref, b4_ref, o_ref):
    # bf16 operands on the MXU, f32 accumulation; bias adds and tanh in f32.
    x = x_ref[...].astype(jnp.bfloat16)
    h = jnp.tanh(jnp.dot(x, w1_ref[...],
                         preferred_element_type=jnp.float32) + b1_ref[...])
    h = jnp.tanh(jnp.dot(h.astype(jnp.bfloat16), w2_ref[...],
                         preferred_element_type=jnp.float32) + b2_ref[...])
    h = jnp.tanh(jnp.dot(h.astype(jnp.bfloat16), w3_ref[...],
                         preferred_element_type=jnp.float32) + b3_ref[...])
    o_ref[...] = (jnp.dot(h.astype(jnp.bfloat16), w4_ref[...],
                          preferred_element_type=jnp.float32) + b4_ref[...])
    # TODO(synk): nn.Dropout(p=0.1) is identity in eval(); training-mode dropout
    # (pltpu.prng_seed + pltpu.prng_random_bits keep-mask, scale 1/0.9) not implemented.


def prepare_params(w1, b1, w2, b2, w3, b3, w4, b4):
    """One-time param prep: pad the 64-wide layer / output to lane-aligned widths,
    cast weights to bf16 (halves weight DMA), biases kept f32 as (1, N) rows."""
    out_dim = w4.shape[1]
    w3p = jnp.pad(w3, ((0, 0), (0, H3_PAD - H3)))
    b3p = jnp.pad(b3, (0, H3_PAD - H3))
    w4p = jnp.pad(w4, ((0, H3_PAD - H3), (0, OUT_PAD - out_dim)))
    b4p = jnp.pad(b4, (0, OUT_PAD - out_dim))
    row = lambda b: b.reshape(1, -1).astype(jnp.float32)
    return (w1.astype(jnp.bfloat16), row(b1),
            w2.astype(jnp.bfloat16), row(b2),
            w3p.astype(jnp.bfloat16), row(b3p),
            w4p.astype(jnp.bfloat16), row(b4p))


@functools.partial(jax.jit, static_argnames=("out_dim", "block_b"))
def osi_forward(x, params, *, out_dim, block_b=None):
    """OSI forward (eval mode). x: (B, in_dim) f32 -> (B, out_dim) f32."""
    w1, b1, w2, b2, w3, b3, w4, b4 = params
    B, in_dim = x.shape
    if block_b is None:
        # >=128 rows per tile fills the MXU and amortizes per-grid-step overhead when B allows.
        block_b = 256 if (B >= 256 and B % 256 == 0) else B
    nb = B // block_b

    def wspec(shape):  # weight/bias blocks stay resident across the batch grid
        return pl.BlockSpec(shape, lambda i: (0, 0))

    out_pad = pl.pallas_call(
        _osi_kernel,
        out_shape=jax.ShapeDtypeStruct((B, OUT_PAD), jnp.float32),
        grid=(nb,),
        in_specs=[
            pl.BlockSpec((block_b, in_dim), lambda i: (i, 0)),
            wspec((in_dim, H1)), wspec((1, H1)),
            wspec((H1, H2)), wspec((1, H2)),
            wspec((H2, H3_PAD)), wspec((1, H3_PAD)),
            wspec((H3_PAD, OUT_PAD)), wspec((1, OUT_PAD)),
        ],
        out_specs=pl.BlockSpec((block_b, OUT_PAD), lambda i: (i, 0)),
        compiler_params=pltpu.CompilerParams(
            dimension_semantics=("parallel",)),  # batch tiles shard across v7x's 2 TCs
    )(x, w1, b1, w2, b2, w3, b3, w4, b4)

    return out_pad[:, :out_dim]


if __name__ == "__main__":
    B, IN_DIM, OUT_DIM = 8, 16, 10

    key = jax.random.PRNGKey(0)
    kx, *kp = jax.random.split(key, 9)

    def linear_init(kw, kb, fan_in, fan_out):
        bound = 1.0 / math.sqrt(fan_in)
        w = jax.random.uniform(kw, (fan_in, fan_out), jnp.float32, -bound, bound)
        b = jax.random.uniform(kb, (fan_out,), jnp.float32, -bound, bound)
        return w, b

    w1, b1 = linear_init(kp[0], kp[1], IN_DIM, H1)
    w2, b2 = linear_init(kp[2], kp[3], H1, H2)
    w3, b3 = linear_init(kp[4], kp[5], H2, H3)
    w4, b4 = linear_init(kp[6], kp[7], H3, OUT_DIM)

    x = jax.random.normal(kx, (B, IN_DIM), jnp.float32)

    params = prepare_params(w1, b1, w2, b2, w3, b3, w4, b4)
    out = osi_forward(x, params, out_dim=OUT_DIM)
    jax.block_until_ready(out)

    # Pure-JAX reference with identical bf16-operand / f32-accumulate matmul semantics (eval mode).
    def ref(xv):
        def lin(h, w, b):
            return jnp.dot(h.astype(jnp.bfloat16), w.astype(jnp.bfloat16),
                           preferred_element_type=jnp.float32) + b
        h = jnp.tanh(lin(xv, w1, b1))
        h = jnp.tanh(lin(h, w2, b2))
        h = jnp.tanh(lin(h, w3, b3))
        return lin(h, w4, b4)

    out_ref = ref(x)
    assert out.shape == (B, OUT_DIM), out.shape
    assert jnp.allclose(out, out_ref, atol=1e-3, rtol=1e-3), \
        float(jnp.max(jnp.abs(out - out_ref)))

    print("KERNEL_OK")
</pallas_src>

<mosaic_0001>
module attributes {stable_mosaic.version = 11 : i64} {
  func.func @_osi_kernel(%arg0: i32, %arg1: memref<8x16xf32, #tpu.memory_space<vmem>>, %arg2: memref<16x256xbf16, #tpu.memory_space<vmem>>, %arg3: memref<1x256xf32, #tpu.memory_space<vmem>>, %arg4: memref<256x128xbf16, #tpu.memory_space<vmem>>, %arg5: memref<1x128xf32, #tpu.memory_space<vmem>>, %arg6: memref<128x128xbf16, #tpu.memory_space<vmem>>, %arg7: memref<1x128xf32, #tpu.memory_space<vmem>>, %arg8: memref<128x128xbf16, #tpu.memory_space<vmem>>, %arg9: memref<1x128xf32, #tpu.memory_space<vmem>>, %arg10: memref<8x128xf32, #tpu.memory_space<vmem>>) attributes {dimension_semantics = [#tpu.dimension_semantics<parallel>], iteration_bounds = array<i64: 1>, scalar_prefetch = 0 : i64, scratch_operands = 0 : i64, tpu.core_type = #tpu.core_type<tc>, window_params = [{transform_indices = @transform_0, window_bounds = array<i64: 8, 16>}, {pipeline_mode = #tpu.pipeline_mode<synchronous>, transform_indices = @transform_1, window_bounds = array<i64: 16, 256>}, {pipeline_mode = #tpu.pipeline_mode<synchronous>, transform_indices = @transform_2, window_bounds = array<i64: 1, 256>}, {pipeline_mode = #tpu.pipeline_mode<synchronous>, transform_indices = @transform_3, window_bounds = array<i64: 256, 128>}, {pipeline_mode = #tpu.pipeline_mode<synchronous>, transform_indices = @transform_4, window_bounds = array<i64: 1, 128>}, {pipeline_mode = #tpu.pipeline_mode<synchronous>, transform_indices = @transform_5, window_bounds = array<i64: 128, 128>}, {pipeline_mode = #tpu.pipeline_mode<synchronous>, transform_indices = @transform_6, window_bounds = array<i64: 1, 128>}, {pipeline_mode = #tpu.pipeline_mode<synchronous>, transform_indices = @transform_7, window_bounds = array<i64: 128, 128>}, {pipeline_mode = #tpu.pipeline_mode<synchronous>, transform_indices = @transform_8, window_bounds = array<i64: 1, 128>}, {transform_indices = @transform_9, window_bounds = array<i64: 8, 128>}]} {
    %c0 = arith.constant 0 : index
    %c0_0 = arith.constant 0 : index
    %0 = vector.load %arg1[%c0, %c0_0] : memref<8x16xf32, #tpu.memory_space<vmem>>, vector<8x16xf32>
    %1 = arith.truncf %0 : vector<8x16xf32> to vector<8x16xbf16>
    %c0_1 = arith.constant 0 : index
    %c0_2 = arith.constant 0 : index
    %2 = vector.load %arg2[%c0_1, %c0_2] : memref<16x256xbf16, #tpu.memory_space<vmem>>, vector<16x256xbf16>
    %cst = arith.constant dense<0.000000e+00> : vector<8x256xf32>
    %3 = tpu.matmul %1, %2, %cst {dimension_numbers = #tpu.dot_dimension_numbers<[1], [0], [0], [1], [0, 0, 1, 1], [], []>} : vector<8x16xbf16>, vector<16x256xbf16>, vector<8x256xf32> -> vector<8x256xf32>
    %c0_3 = arith.constant 0 : index
    %c0_4 = arith.constant 0 : index
    %4 = vector.load %arg3[%c0_3, %c0_4] : memref<1x256xf32, #tpu.memory_space<vmem>>, vector<1x256xf32>
    %5 = vector.broadcast %4 : vector<1x256xf32> to vector<8x256xf32>
    %6 = arith.addf %3, %5 : vector<8x256xf32>
    %7 = math.tanh %6 : vector<8x256xf32>
    %8 = arith.truncf %7 : vector<8x256xf32> to vector<8x256xbf16>
    %c0_5 = arith.constant 0 : index
    %c0_6 = arith.constant 0 : index
    %9 = vector.load %arg4[%c0_5, %c0_6] : memref<256x128xbf16, #tpu.memory_space<vmem>>, vector<256x128xbf16>
    %cst_7 = arith.constant dense<0.000000e+00> : vector<8x128xf32>
    %10 = tpu.matmul %8, %9, %cst_7 {dimension_numbers = #tpu.dot_dimension_numbers<[1], [0], [0], [1], [0, 0, 1, 1], [], []>} : vector<8x256xbf16>, vector<256x128xbf16>, vector<8x128xf32> -> vector<8x128xf32>
    %c0_8 = arith.constant 0 : index
    %c0_9 = arith.constant 0 : index
    %11 = vector.load %arg5[%c0_8, %c0_9] : memref<1x128xf32, #tpu.memory_space<vmem>>, vector<1x128xf32>
    %12 = vector.broadcast %11 : vector<1x128xf32> to vector<8x128xf32>
    %13 = arith.addf %10, %12 : vector<8x128xf32>
    %14 = math.tanh %13 : vector<8x128xf32>
    %15 = arith.truncf %14 : vector<8x128xf32> to vector<8x128xbf16>
    %c0_10 = arith.constant 0 : index
    %c0_11 = arith.constant 0 : index
    %16 = vector.load %arg6[%c0_10, %c0_11] : memref<128x128xbf16, #tpu.memory_space<vmem>>, vector<128x128xbf16>
    %cst_12 = arith.constant dense<0.000000e+00> : vector<8x128xf32>
    %17 = tpu.matmul %15, %16, %cst_12 {dimension_numbers = #tpu.dot_dimension_numbers<[1], [0], [0], [1], [0, 0, 1, 1], [], []>} : vector<8x128xbf16>, vector<128x128xbf16>, vector<8x128xf32> -> vector<8x128xf32>
    %c0_13 = arith.constant 0 : index
    %c0_14 = arith.constant 0 : index
    %18 = vector.load %arg7[%c0_13, %c0_14] : memref<1x128xf32, #tpu.memory_space<vmem>>, vector<1x128xf32>
    %19 = vector.broadcast %18 : vector<1x128xf32> to vector<8x128xf32>
    %20 = arith.addf %17, %19 : vector<8x128xf32>
    %21 = math.tanh %20 : vector<8x128xf32>
    %22 = arith.truncf %21 : vector<8x128xf32> to vector<8x128xbf16>
    %c0_15 = arith.constant 0 : index
    %c0_16 = arith.constant 0 : index
    %23 = vector.load %arg8[%c0_15, %c0_16] : memref<128x128xbf16, #tpu.memory_space<vmem>>, vector<128x128xbf16>
    %cst_17 = arith.constant dense<0.000000e+00> : vector<8x128xf32>
    %24 = tpu.matmul %22, %23, %cst_17 {dimension_numbers = #tpu.dot_dimension_numbers<[1], [0], [0], [1], [0, 0, 1, 1], [], []>} : vector<8x128xbf16>, vector<128x128xbf16>, vector<8x128xf32> -> vector<8x128xf32>
    %c0_18 = arith.constant 0 : index
    %c0_19 = arith.constant 0 : index
    %25 = vector.load %arg9[%c0_18, %c0_19] : memref<1x128xf32, #tpu.memory_space<vmem>>, vector<1x128xf32>
    %26 = vector.broadcast %25 : vector<1x128xf32> to vector<8x128xf32>
    %27 = arith.addf %24, %26 : vector<8x128xf32>
    %c0_20 = arith.constant 0 : index
    %c0_21 = arith.constant 0 : index
    %28 = vector.load %arg10[%c0_20, %c0_21] : memref<8x128xf32, #tpu.memory_space<vmem>>, vector<8x128xf32>
    tpu.vector_store %arg10[%c0_20, %c0_21], %27 {strides = array<i32>} : memref<8x128xf32, #tpu.memory_space<vmem>>, vector<8x128xf32>,
    return
  }
  func.func @transform_0(%arg0: i32) -> (i32, i32) {
    %c0_i32 = arith.constant 0 : i32
    %c0_i32_0 = arith.constant 0 : i32
    return %arg0, %c0_i32 : i32, i32
  }
  func.func @transform_1(%arg0: i32) -> (i32, i32) {
    %c0_i32 = arith.constant 0 : i32
    %c0_i32_0 = arith.constant 0 : i32
    %c0_i32_1 = arith.constant 0 : i32
    return %c0_i32, %c0_i32_0 : i32, i32
  }
  func.func @transform_2(%arg0: i32) -> (i32, i32) {
    %c0_i32 = arith.constant 0 : i32
    %c0_i32_0 = arith.constant 0 : i32
    %c0_i32_1 = arith.constant 0 : i32
    return %c0_i32, %c0_i32_0 : i32, i32
  }
  func.func @transform_3(%arg0: i32) -> (i32, i32) {
    %c0_i32 = arith.constant 0 : i32
    %c0_i32_0 = arith.constant 0 : i32
    %c0_i32_1 = arith.constant 0 : i32
    return %c0_i32, %c0_i32_0 : i32, i32
  }
  func.func @transform_4(%arg0: i32) -> (i32, i32) {
    %c0_i32 = arith.constant 0 : i32
    %c0_i32_0 = arith.constant 0 : i32
    %c0_i32_1 = arith.constant 0 : i32
    return %c0_i32, %c0_i32_0 : i32, i32
  }
  func.func @transform_5(%arg0: i32) -> (i32, i32) {
    %c0_i32 = arith.constant 0 : i32
    %c0_i32_0 = arith.constant 0 : i32
    %c0_i32_1 = arith.constant 0 : i32
    return %c0_i32, %c0_i32_0 : i32, i32
  }
  func.func @transform_6(%arg0: i32) -> (i32, i32) {
    %c0_i32 = arith.constant 0 : i32
    %c0_i32_0 = arith.constant 0 : i32
    %c0_i32_1 = arith.constant 0 : i32
    return %c0_i32, %c0_i32_0 : i32, i32
  }
  func.func @transform_7(%arg0: i32) -> (i32, i32) {
    %c0_i32 = arith.constant 0 : i32
    %c0_i32_0 = arith.constant 0 : i32
    %c0_i32_1 = arith.constant 0 : i32
    return %c0_i32, %c0_i32_0 : i32, i32
  }
  func.func @transform_8(%arg0: i32) -> (i32, i32) {
    %c0_i32 = arith.constant 0 : i32
    %c0_i32_0 = arith.constant 0 : i32
    %c0_i32_1 = arith.constant 0 : i32
    return %c0_i32, %c0_i32_0 : i32, i32
  }
  func.func @transform_9(%arg0: i32) -> (i32, i32) {
    %c0_i32 = arith.constant 0 : i32
    %c0_i32_0 = arith.constant 0 : i32
    return %arg0, %c0_i32 : i32, i32
  }
}

</mosaic_0001>

<bundles_post_ra>
// kernel: osi_forward.1
= control target key start
LH: loop header
LB: loop body
LE: loop exit
PB: predicated region body
PF: predicated region fallthrough
CT: control target
= control target key end

     0   :  { %14 = vsyncpa [#allocation3], 0  ;;  %s1082_s0 = inlined_call_operand.hbm [shape: f32[8,16], index: 0, kind: input, shape index: {}]   ;;  %s1083_s1 = inlined_call_operand.hbm [shape: bf16[16,256], index: 1, kind: input, shape index: {}]   ;;  %s1084_s2 = inlined_call_operand.vmem [shape: f32[1,256], index: 2, kind: input, shape index: {}]   ;;  %s1085_s3 = inlined_call_operand.hbm [shape: bf16[256,128], index: 3, kind: input, shape index: {}]   ;;  %s1086_s4 = inlined_call_operand.vmem [shape: f32[1,128], index: 4, kind: input, shape index: {}]   ;;  %s1087_s5 = inlined_call_operand.hbm [shape: bf16[128,128], index: 5, kind: input, shape index: {}]   ;;  %s1088_s6 = inlined_call_operand.vmem [shape: f32[1,128], index: 6, kind: input, shape index: {}]   ;;  %s1089_s7 = inlined_call_operand.hbm [shape: bf16[128,128], index: 7, kind: input, shape index: {}]   ;;  %s1090_s8 = inlined_call_operand.vmem [shape: f32[1,128], index: 8, kind: input, shape index: {}]   ;;  %s1091_s9 = inlined_call_operand.hbm [shape: f32[8,128], index: 9, kind: output, shape index: {}]  }
   0x1   :  { %15 = vsyncpa [#allocation6], 0 }
   0x2   :  { %16 = vsyncpa [#allocation9], 0 }
   0x3   :  { %17 = vsyncpa [#allocation4], 0  ;;  %s908_s30 = smov [#allocation5]   ;;  %s768_s13 = scalar_lea.hbm %s1083_s1, 256 }
   0x4   :  { %s33_s10 = sshll.u32 %s908_s30, 4  ;;  %p769_p0 = scmp.ne.s32.totalorder %s1083_s1, %s768_s13  ;;  %s34_s10 = int_to_ptr.vmem [resolvable:$true] %s33_s10 }
   0x5   :  { %p772_p1 = scmp.lt.u32.totalorder %s768_s13, %s1083_s1 }
   0x7   :  { %p774_p2 = pnand %p772_p1, %p769_p0 }
   0x9   :  { %777 = shalt.err (!%p774_p2)
}
   0xa   :  { %s778_s18 = scalar_lea.vmem %s34_s10, 256  ;;  %p783_p4 = scmp.lt.s32.totalorder %s34_s10, %s34_s10 }
   0xb   :  { %p779_p3 = scmp.ne.s32.totalorder %s34_s10, %s778_s18  ;;  %p784_p5 = scmp.lt.s32.totalorder %s778_s18, %s778_s18 }
   0xd   :  { %p785_p6 = por %p784_p5, %p783_p4 }
   0xf   :  { %p786_p7 = pnand %p785_p6, %p779_p3 }
  0x11   :  { %789 = shalt.err (!%p786_p7)
}
  0x12   :  { %s909_s19 = smov 128   ;;  %s910_s20 = smov 8  }
  0x13   :  { %39 = dma.hbm_to_vmem [thread:$0]  %s1083_s1, 256, %s34_s10, [#allocation6], %s909_s19, %s909_s19, %s910_s20  }
  0x14   :  { %s911_s23 = smov [#allocation8]   ;;  %s912_s25 = smov [#allocation2]  }
  0x15   :  { %s61_s24 = sshll.u32 %s911_s23, 4  ;;  %s24_s26 = sshll.u32 %s912_s25, 4  ;;  %s62_s24 = int_to_ptr.vmem [resolvable:$true] %s61_s24  ;;  %s25_s26 = int_to_ptr.vmem [resolvable:$true] %s24_s26 }
  0x16   :  { %s790_s29 = scalar_lea.hbm %s1087_s5, 1024 }
  0x17   :  { %p791_p8 = scmp.ne.s32.totalorder %s1087_s5, %s790_s29  ;;  %p794_p9 = scmp.lt.u32.totalorder %s790_s29, %s1087_s5 }
  0x19   :  { %p796_p10 = pnand %p794_p9, %p791_p8 }
  0x1b   :  { %799 = shalt.err (!%p796_p10)
}
  0x1c   :  { %s800_s1 = scalar_lea.vmem %s62_s24, 1024  ;;  %p805_p12 = scmp.lt.s32.totalorder %s62_s24, %s62_s24 }
  0x1d   :  { %p801_p11 = scmp.ne.s32.totalorder %s62_s24, %s800_s1  ;;  %p806_p13 = scmp.lt.s32.totalorder %s800_s1, %s800_s1 }
  0x1f   :  { %p807_p0 = por %p806_p13, %p805_p12 }
  0x21   :  { %p808_p1 = pnand %p807_p0, %p801_p11 }
  0x23   :  { %811 = shalt.err (!%p808_p1)
}
  0x24   :  { %s913_s10 = smov 64   ;;  %s914_s14 = smov 4  }
  0x25   :  { %67 = dma.hbm_to_vmem [thread:$0]  %s1087_s5, 1024, %s62_s24, [#allocation9], %s913_s10, %s913_s10, %s914_s14  }
  0x26   :  { %s812_s19 = scalar_lea.hbm %s1082_s0, 128 }
  0x27   :  { %p813_p2 = scmp.ne.s32.totalorder %s1082_s0, %s812_s19  ;;  %p816_p3 = scmp.lt.u32.totalorder %s812_s19, %s1082_s0 }
  0x29   :  { %p818_p4 = pnand %p816_p3, %p813_p2 }
  0x2b   :  { %821 = shalt.err (!%p818_p4)
}
  0x2c   :  { %s822_s25 = scalar_lea.vmem %s25_s26, 128  ;;  %p827_p6 = scmp.lt.s32.totalorder %s25_s26, %s25_s26 }
  0x2d   :  { %p823_p5 = scmp.ne.s32.totalorder %s25_s26, %s822_s25  ;;  %p828_p7 = scmp.lt.s32.totalorder %s822_s25, %s822_s25 }
  0x2f   :  { %p829_p8 = por %p828_p7, %p827_p6 }
  0x31   :  { %p830_p9 = pnand %p829_p8, %p823_p5 }
  0x33   :  { %833 = shalt.err (!%p830_p9)
}
  0x34   :  { %27 = dma.hbm_to_vmem [thread:$0]  %s1082_s0, 128, %s25_s26, [#allocation3]  }
  0x35   :  { %s915_s27 = smov [#allocation7]   ;;  %s916_s29 = smov [#allocation10]  }
  0x36   :  { %s47_s28 = sshll.u32 %s915_s27, 4  ;;  %s75_s30 = sshll.u32 %s916_s29, 4  ;;  %s48_s28 = int_to_ptr.vmem [resolvable:$true] %s47_s28  ;;  %s76_s30 = int_to_ptr.vmem [resolvable:$true] %s75_s30 }
  0x37   :  { %s834_s13 = scalar_lea.hbm %s1085_s3, 2048 }
  0x38   :  { %p835_p10 = scmp.ne.s32.totalorder %s1085_s3, %s834_s13  ;;  %p838_p11 = scmp.lt.u32.totalorder %s834_s13, %s1085_s3 }
  0x3a   :  { %p840_p12 = pnand %p838_p11, %p835_p10 }
  0x3c   :  { %843 = shalt.err (!%p840_p12)
}
  0x3d   :  { %s844_s0 = scalar_lea.vmem %s48_s28, 2048  ;;  %p849_p0 = scmp.lt.s32.totalorder %s48_s28, %s48_s28 }
  0x3e   :  { %p845_p13 = scmp.ne.s32.totalorder %s48_s28, %s844_s0  ;;  %p850_p1 = scmp.lt.s32.totalorder %s844_s0, %s844_s0 }
  0x40   :  { %p851_p2 = por %p850_p1, %p849_p0 }
  0x42   :  { %p852_p3 = pnand %p851_p2, %p845_p13 }
  0x44   :  { %855 = shalt.err (!%p852_p3)
}
  0x45   :  { %53 = dma.hbm_to_vmem [thread:$0]  %s1085_s3, 2048, %s48_s28, [#allocation6], %s913_s10, %s913_s10, %s914_s14  }
  0x46   :  { %s856_s21 = scalar_lea.hbm %s1089_s7, 1024 }
  0x47   :  { %p857_p4 = scmp.ne.s32.totalorder %s1089_s7, %s856_s21  ;;  %p860_p5 = scmp.lt.u32.totalorder %s856_s21, %s1089_s7 }
  0x49   :  { %p862_p6 = pnand %p860_p5, %p857_p4 }
  0x4b   :  { %865 = shalt.err (!%p862_p6)
}
  0x4c   :  { %s866_s24 = scalar_lea.vmem %s76_s30, 1024  ;;  %p871_p8 = scmp.lt.s32.totalorder %s76_s30, %s76_s30 }
  0x4d   :  { %p867_p7 = scmp.ne.s32.totalorder %s76_s30, %s866_s24  ;;  %p872_p9 = scmp.lt.s32.totalorder %s866_s24, %s866_s24 }
  0x4f   :  { %p873_p10 = por %p872_p9, %p871_p8 }
  0x51   :  { %p874_p11 = pnand %p873_p10, %p867_p7 }
  0x53   :  { %877 = shalt.err (!%p874_p11)
}
  0x54   :  { %81 = dma.hbm_to_vmem [thread:$0]  %s1089_s7, 1024, %s76_s30, [#allocation9], %s913_s10, %s913_s10, %s914_s14  }
  0x55   :  { %900 = dma.done.wait [#allocation3], 128  }
  0x56   :  { %901 = vsyncadd [#allocation3], 4294967168 }
  0x57   :  { %902 = dma.done.wait [#allocation6], 2304  }
  0x58   :  { %903 = vsyncadd [#allocation6], 4294964992 }
  0x59   :  { %904 = dma.done.wait [#allocation9], 2048  }
  0x5a   :  { %905 = vsyncadd [#allocation9], 4294965248  ;;  %v917_v0 = vmov 0   ;;  %v725_v1 = vld [vmem:[#allocation5 + $0x4] ss:$8 sps:$4 sm:$0xff]   ;;  %v100_v3 = vld [vmem:[#allocation2] sm:$0xff]  ;;  %v106_v25 = vlaneseq }
  0x5b   :  { %162 = vmatprep.mubr.bf16.mxu0 %v917_v0  ;;  %v727_v2 = vld [vmem:[#allocation5] ss:$8 sps:$4 sm:$0xff]   ;;  %130 = vmatprep.subr.bf16.mxu0 %v725_v1  ;;  %v101_v4 = vpack.c.bf16 %v100_v3, %v100_v3  ;;  %v728_v5 = vld [vmem:[#allocation7 + $0x40] sm:$0xff]   ;;  %vm126_vm0 = vcmask 130048   ;;  %v730_v7 = vld [vmem:[#allocation7 + $0x48] sm:$0xff]   ;;  %v918_v22 = vmov 0.0  }
  0x5c   :  { %131 = vmatpush1.bf16.msra.mxu0 %v727_v2  ;;  %v729_v6 = vld [vmem:[#allocation7] sm:$0xff]   ;;  %632 = vmatprep.subr.bf16.mxu1 %v728_v5  ;;  %v731_v8 = vld [vmem:[#allocation7 + $0x8] sm:$0xff]   ;;  %v732_v9 = vld [vmem:[#allocation7 + $0x50] sm:$0xff]   ;;  %v107_v26 = vshrl.u32 %v106_v25, 7  ;;  %vm919_vm1 = vmmov 0   ;;  %s920_s11 = smov [#allocation11]  }
  0x5d   :  { %633 = vmatpush3.bf16.msra.mxu1 %v729_v6  ;;  %v733_v10 = vld [vmem:[#allocation7 + $0x10] sm:$0xff]   ;;  %v734_v11 = vld [vmem:[#allocation7 + $0x58] sm:$0xff]   ;;  %v736_v13 = vld [vmem:[#allocation7 + $0x60] sm:$0xff]   ;;  %672 = vmatprep.subr.bf16.mxu0 %v918_v22  ;;  %s583_s12 = sshll.u32 %s920_s11, 4  ;;  %s584_s12 = int_to_ptr.vmem [resolvable:$true] %s583_s12 }
  0x5e   :  { %634 = vmatprep.subr.bf16.mxu1 %v730_v7  ;;  %v735_v12 = vld [vmem:[#allocation7 + $0x18] sm:$0xff]   ;;  %v737_v14 = vld [vmem:[#allocation7 + $0x20] sm:$0xff]   ;;  %v738_v15 = vld [vmem:[#allocation7 + $0x68] sm:$0xff]   ;;  %v108_v27 = vsub.s32 0, %v107_v26  ;;  %v112_v29 = vsub.s32 1, %v107_v26  ;;  %p883_p13 = scmp.lt.s32.totalorder %s584_s12, %s584_s12 }
  0x5f   :  { %596 = vmatmul.mubr.msk.bf16.vlgmr.msra.gmra.mrb[0].mxu0 %vm126_vm0, %v101_v4  ;;  %v739_v16 = vld [vmem:[#allocation7 + $0x28] sm:$0xff]   ;;  %v740_v17 = vld [vmem:[#allocation7 + $0x70] sm:$0xff]   ;;  %v742_v19 = vld [vmem:[#allocation7 + $0x78] sm:$0xff]  }
  0x60   :  { %v741_v18 = vld [vmem:[#allocation7 + $0x30] sm:$0xff]   ;;  %v743_v20 = vld [vmem:[#allocation7 + $0x38] sm:$0xff]   ;;  %v744_v21 = vld [vmem:[#allocation8] sm:$0xff]   ;;  %688 = vmatprep.mubr.msk.bf16.mxu0 %vm919_vm1, %v918_v22 }
  0x61   :  { %635 = vmatpush3.bf16.msra.mxu1 %v731_v8  ;;  %673 = vmatpush3.bf16.msra.mxu0 %v744_v21  ;;  %v745_v23 = vld [vmem:[#allocation8 + $0x8] sm:$0xff]   ;;  %v746_v24 = vld [vmem:[#allocation8 + $0x10] sm:$0xff]   ;;  %v747_v42 = vld [vmem:[#allocation8 + $0x18] sm:$0xff]  }
  0x62   :  { %636 = vmatprep.subr.bf16.mxu1 %v732_v9  ;;  %674 = vmatprep.subr.bf16.mxu0 %v918_v22  ;;  %v104_v28 = vld [vmem:[%s1084_s2] sm:$0x3]  ;;  %v748_v43 = vld [vmem:[#allocation8 + $0x20] sm:$0xff]   ;;  %v750_v45 = vld [vmem:[#allocation8 + $0x30] sm:$0xff]  }
  0x63   :  { %v109_v30 = vrot.slane %v104_v28, %v108_v27  ;;  %v113_v31 = vrot.slane %v104_v28, %v112_v29  ;;  %v749_v44 = vld [vmem:[#allocation8 + $0x28] sm:$0xff]   ;;  %v751_v46 = vld [vmem:[#allocation8 + $0x38] sm:$0xff]   ;;  %v752_v47 = vld [vmem:[#allocation10] sm:$0xff]  }
  0x64   :  { %v753_v48 = vld [vmem:[#allocation10 + $0x8] sm:$0xff]   ;;  %v754_v49 = vld [vmem:[#allocation10 + $0x10] sm:$0xff]   ;;  %v755_v50 = vld [vmem:[#allocation10 + $0x18] sm:$0xff]  }
  0x65   :  { %637 = vmatpush3.bf16.msra.mxu1 %v733_v10  ;;  %675 = vmatpush3.bf16.msra.mxu0 %v745_v23  ;;  %v597_v52 = vld [vmem:[%s1086_s4] ss:$0 sm:$0xff]  ;;  %v756_v60 = vld [vmem:[#allocation10 + $0x20] sm:$0xff]   ;;  %v758_v62 = vld [vmem:[#allocation10 + $0x30] sm:$0xff]  }
  0x66   :  { %638 = vmatprep.subr.bf16.mxu1 %v734_v11  ;;  %676 = vmatprep.subr.bf16.mxu0 %v918_v22  ;;  %v757_v61 = vld [vmem:[#allocation10 + $0x28] sm:$0xff]   ;;  %v759_v63 = vld [vmem:[#allocation10 + $0x38] sm:$0xff]  }
  0x67   :  { %v614_v0 = vld [vmem:[%s1088_s6] ss:$0 sm:$0xff]  ;;  %s878_s6 = scalar_lea.vmem %s584_s12, 128 }
  0x68   :  { %v623_v8 = vld [vmem:[%s1090_s8] ss:$0 sm:$0xff]  ;;  %p879_p12 = scmp.ne.s32.totalorder %s584_s12, %s878_s6  ;;  %p884_p0 = scmp.lt.s32.totalorder %s878_s6, %s878_s6 }
  0x69   :  { %639 = vmatpush3.bf16.msra.mxu1 %v735_v12  ;;  %677 = vmatpush3.bf16.msra.mxu0 %v746_v24 }
  0x6a   :  { %640 = vmatprep.subr.bf16.mxu1 %v736_v13  ;;  %678 = vmatprep.subr.bf16.mxu0 %v918_v22  ;;  %p885_p1 = por %p884_p0, %p883_p13 }
  0x6c   :  { %p886_p2 = pnand %p885_p1, %p879_p12 }
  0x6d   :  { %641 = vmatpush3.bf16.msra.mxu1 %v737_v14  ;;  %679 = vmatpush3.bf16.msra.mxu0 %v747_v42 }
  0x6e   :  { %642 = vmatprep.subr.bf16.mxu1 %v738_v15  ;;  %680 = vmatprep.subr.bf16.mxu0 %v918_v22 }
  0x71   :  { %643 = vmatpush3.bf16.msra.mxu1 %v739_v16  ;;  %681 = vmatpush3.bf16.msra.mxu0 %v748_v43 }
  0x72   :  { %644 = vmatprep.subr.bf16.mxu1 %v740_v17  ;;  %682 = vmatprep.subr.bf16.mxu0 %v918_v22 }
  0x75   :  { %645 = vmatpush3.bf16.msra.mxu1 %v741_v18  ;;  %683 = vmatpush3.bf16.msra.mxu0 %v749_v44 }
  0x76   :  { %646 = vmatprep.subr.bf16.mxu1 %v742_v19  ;;  %684 = vmatprep.subr.bf16.mxu0 %v918_v22 }
  0x79   :  { %647 = vmatpush3.bf16.msra.mxu1 %v743_v20  ;;  %685 = vmatpush3.bf16.msra.mxu0 %v750_v45 }
  0x7a   :  { %692 = vmatprep.subr.bf16.mxu1 %v918_v22  ;;  %686 = vmatprep.subr.bf16.mxu0 %v918_v22 }
  0x7d   :  { %687 = vmatpush3.bf16.msra.mxu0 %v751_v46 }
 0x132   :  { %v164_v32 = vpop.f32.mrb[0].mxu0 }
 0x133   :  { %v165_v33 = vadd.f32 %v164_v32, %v109_v30  ;;  %v166_v34 = vpop.f32.mrb[1].mxu0 }
 0x134   :  { %v167_v35 = vadd.f32 %v166_v34, %v113_v31  ;;  %v168_v36 = vpop.f32.mrb[2].mxu0 }
 0x135   :  { %760 = vtanh.f32 %v165_v33  ;;  %v169_v37 = vpop.f32.mrb[3].mxu0 }
 0x136   :  { %762 = vtanh.f32 %v167_v35 }
 0x13f   :  { %v761_v38 = vpop.eup %760 }
 0x140   :  { %v763_v39 = vpop.eup %762  ;;  %v173_v41 = vpack.c.bf16 %v761_v38, %v761_v38 }
 0x141   :  { %v174_v40 = vpack.c.bf16 %v763_v39, %v763_v39 }
 0x143   :  { %342 = vmatprep.mubr.bf16.mxu1 %v174_v40 }
 0x144   :  { %343 = vmatmul.mubr.bf16.vlgmr.msra.gmra.mrb[0].mxu1 %v173_v41 }
 0x145   :  { %708 = vmatprep.mubr.msk.bf16.mxu1 %vm919_vm1, %v918_v22  ;;  %693 = vmatpush3.bf16.msra.mxu1 %v752_v47 }
 0x146   :  { %694 = vmatprep.subr.bf16.mxu1 %v918_v22 }
 0x149   :  { %695 = vmatpush3.bf16.msra.mxu1 %v753_v48 }
 0x14a   :  { %696 = vmatprep.subr.bf16.mxu1 %v918_v22 }
 0x14d   :  { %697 = vmatpush3.bf16.msra.mxu1 %v754_v49 }
 0x14e   :  { %698 = vmatprep.subr.bf16.mxu1 %v918_v22 }
 0x151   :  { %699 = vmatpush3.bf16.msra.mxu1 %v755_v50 }
 0x152   :  { %700 = vmatprep.subr.bf16.mxu1 %v918_v22 }
 0x155   :  { %701 = vmatpush3.bf16.msra.mxu1 %v756_v60 }
 0x156   :  { %702 = vmatprep.subr.bf16.mxu1 %v918_v22 }
 0x159   :  { %703 = vmatpush3.bf16.msra.mxu1 %v757_v61 }
 0x15a   :  { %704 = vmatprep.subr.bf16.mxu1 %v918_v22 }
 0x15d   :  { %705 = vmatpush3.bf16.msra.mxu1 %v758_v62 }
 0x15e   :  { %706 = vmatprep.subr.bf16.mxu1 %v918_v22 }
 0x161   :  { %707 = vmatpush3.bf16.msra.mxu1 %v759_v63 }
 0x217   :  { %v648_v51 = vpop.f32.mrb[0].mxu1 }
 0x218   :  { %v649_v53 = vpop.f32.mrb[1].mxu1 }
 0x219   :  { %v650_v54 = vadd.f32 %v649_v53, %v648_v51  ;;  %v651_v55 = vpop.f32.mrb[2].mxu1 }
 0x21a   :  { %v652_v56 = vpop.f32.mrb[3].mxu1 }
 0x21b   :  { %v345_v57 = vadd.f32 %v650_v54, %v597_v52 }
 0x21d   :  { %764 = vtanh.f32 %v345_v57 }
 0x227   :  { %v765_v58 = vpop.eup %764 }
 0x228   :  { %v351_v59 = vpack.c.bf16 %v765_v58, %v765_v58 }
 0x22a   :  { %689 = vmatmul.mubr.bf16.vlgmr.msra.gmra.mrb[4].mxu0 %v351_v59 }
 0x2fd   :  { %v457_v1 = vpop.f32.mrb[4].mxu0 }
 0x2fe   :  { %v458_v2 = vadd.f32 %v614_v0, %v457_v1  ;;  %v690_v3 = vpop.f32.mrb[5].mxu0 }
 0x2ff   :  { %v460_v4 = vpop.f32.mrb[6].mxu0 }
 0x300   :  { %766 = vtanh.f32 %v458_v2  ;;  %v691_v5 = vpop.f32.mrb[7].mxu0 }
 0x30a   :  { %v767_v6 = vpop.eup %766 }
 0x30b   :  { %v464_v7 = vpack.c.bf16 %v767_v6, %v767_v6 }
 0x30d   :  { %709 = vmatmul.mubr.bf16.vlgmr.msra.gmra.mrb[4].mxu1 %v464_v7 }
 0x3e0   :  { %v570_v9 = vpop.f32.mrb[4].mxu1 }
 0x3e1   :  { %v571_v10 = vadd.f32 %v623_v8, %v570_v9  ;;  %v710_v11 = vpop.f32.mrb[5].mxu1 }
 0x3e2   :  { %v573_v12 = vpop.f32.mrb[6].mxu1 }
 0x3e3   :  { %576 = vst [vmem:[#allocation11] sm:$0xff] %v571_v10  ;;  %v711_v13 = vpop.f32.mrb[7].mxu1 }
 0x3e4   :  { %889 = shalt.err (!%p886_p2)
}
 0x3e5   :  { %s890_s8 = scalar_lea.hbm %s1091_s9, 128 }
 0x3e6   :  { %p891_p3 = scmp.ne.s32.totalorder %s1091_s9, %s890_s8  ;;  %p894_p4 = scmp.lt.u32.totalorder %s890_s8, %s1091_s9 }
 0x3e8   :  { %p896_p5 = pnand %p894_p4, %p891_p3 }
 0x3ea   :  { %899 = shalt.err (!%p896_p5)
}
 0x3eb   :  { %586 = dma.vmem_to_hbm [thread:$0]  %s584_s12, 128, %s1091_s9, [#allocation4]  }
 0x3ec   :  { %906 = dma.done.wait [#allocation4], 128  }
 0x3ed   :  { %907 = vsyncadd [#allocation4], 4294967168 }
 0x3ee   :  { %590 = vsyncpa [#allocation3], 1 }
 0x3ef   :  { %591 = vsyncpa [#allocation6], 1 }
 0x3f0   :  { %592 = vsyncpa [#allocation9], 1 }
 0x3f1   :  { %593 = vsyncpa [#allocation4], 1 }

</bundles_post_ra>
